<compile_context>
chip_gen: v7x
topology: tpu7x:2x2x1
jax: 0.10.0
libtpu: 0.0.40
codegen_flags: <defaults>
</compile_context>

<pallas_src>
import jax
import jax.numpy as jnp
from jax.experimental import pallas as pl
from jax.experimental.pallas import tpu as pltpu

LMAX = 2
N_POINTS = 1
DIM = (LMAX + 1) ** 2  # 9

_TILE_INPUT_BYTES = 2 * 1024 * 1024      # padded VMEM bytes per input block (see header math)
_MIN_MXU_BATCH = 256                     # below this, pallas_call fixed cost dominates
_MATMUL_PRECISION = jax.lax.Precision.HIGHEST


def _real_sph_harm_lmax2(r):
    """Real spherical harmonics up to l=2 ('integral' normalization), unit-vector input.
    r: (P, 3) -> (P, 9)."""
    # TODO(synk): e3nn's SphericalTensor(lmax,1,1) component order/sign for l>=1 may differ
    # by a fixed permutation/sign flip; validate once against e3nn before comparing numbers
    # with the PyTorch module (the abs-based loss is NOT invariant to a rescaled basis).
    x, y, z = r[:, 0], r[:, 1], r[:, 2]
    c0 = 0.28209479177387814   # 1/(2 sqrt(pi))
    c1 = 0.4886025119029199    # sqrt(3/(4 pi))
    c2a = 1.0925484305920792   # sqrt(15/(4 pi))
    c2b = 0.31539156525252005  # sqrt(5/(16 pi))
    c2c = 0.5462742152960396   # sqrt(15/(16 pi))
    return jnp.stack(
        [
            jnp.full_like(x, c0),
            c1 * x, c1 * y, c1 * z,
            c2a * x * y, c2a * y * z, c2b * (3.0 * z * z - 1.0),
            c2a * x * z, c2c * (x * x - y * y),
        ],
        axis=-1,
    )


def _block_diag_sh(sh_row, q):
    """(q*9, 128) block-diagonal weight: W[9*r + d, r] = sh_row[d]; columns >= q are 0."""
    w9 = q * DIM
    rows = jnp.arange(w9)
    vals = jnp.tile(sh_row.astype(jnp.float32), (q,))
    return jnp.zeros((w9, 128), jnp.float32).at[rows, rows // DIM].set(vals)


def _make_kernel(use_mxu, tbr, valid_rows, need_mask):
    """Kernel over one (tbr, W9) tile of each coefficient array.

    use_mxu=True : w_ref is the (W9, 128) block-diagonal SH matrix; per-row signal via MXU.
    use_mxu=False: w_ref is the (1, 9) SH row; per-row signal via VPU mul + lane reduce.
    """
    def kernel(w_ref, inp_ref, tgt_ref, out_ref):
        x = inp_ref[...].astype(jnp.float32)      # in-kernel upcast (bf16 ingested as-is)
        t = tgt_ref[...].astype(jnp.float32)
        if use_mxu:
            w = w_ref[...]                        # (W9, 128) resident block-diag SH
            ip = jnp.dot(x, w, precision=_MATMUL_PRECISION,
                         preferred_element_type=jnp.float32)          # (tbr, 128)
            tp = jnp.dot(t, w, precision=_MATMUL_PRECISION,
                         preferred_element_type=jnp.float32)
        else:
            sh = w_ref[...]                       # (1, 9)
            ip = jnp.sum(x * sh, axis=-1, keepdims=True)               # (tbr, 1)
            tp = jnp.sum(t * sh, axis=-1, keepdims=True)
        # sum(max(|a|,|b|)) - sum(min(|a|,|b|)) == sum(| |a| - |b| |)
        d = jnp.abs(jnp.abs(ip) - jnp.abs(tp))
        if need_mask:
            # Last grid tile sticks out past the array: zero its (garbage) rows.
            row = pl.program_id(0) * tbr + jax.lax.broadcasted_iota(jnp.int32, d.shape, 0)
            d = jnp.where(row < valid_rows, d, 0.0)
        out_ref[...] = jnp.full(out_ref.shape, jnp.sum(d), jnp.float32)
    return kernel


def _pick_q(b):
    """Largest q in [8, 128] dividing b (free (B,9)->(B/q, q*9) reshape), else 1."""
    for q in range(min(128, b), 7, -1):
        if b % q == 0:
            return q
    return 1


def _tile_rows(rows, row_bytes, tile_bytes):
    """Balanced row tiling -> (num_tiles, tbr, need_mask)."""
    cap = max(8, (tile_bytes // row_bytes) // 8 * 8)
    if rows <= cap:
        return 1, rows, False                               # single tile == full row extent
    num_tiles = -(-rows // cap)                             # cdiv
    tbr = ((-(-rows // num_tiles)) + 7) // 8 * 8            # round_up(cdiv(rows, nt), 8)
    return num_tiles, tbr, num_tiles * tbr != rows


def _dimension_semantics(num_tiles):
    # v7x has 2 TensorCores; plain "parallel" does not shard the grid across them,
    # only CORE_PARALLEL does (perf review).  Single-TC chips keep "parallel".
    try:
        kind = jax.devices()[0].device_kind.lower()
    except Exception:
        kind = ""
    core_parallel = getattr(pltpu, "CORE_PARALLEL", None)
    if num_tiles >= 2 and core_parallel is not None and ("v7" in kind or "tpu7" in kind):
        return (core_parallel,)
    return ("parallel",)


def reconstruction_loss(input_coeffs, target_coeffs, key, tile_bytes=_TILE_INPUT_BYTES):
    """input_coeffs/target_coeffs: (B, 9) SH coefficients (f32 or bf16). Returns f32 loss."""
    b, d = input_coeffs.shape
    assert d == DIM and target_coeffs.shape == (b, DIM)

    # --- glue: random unit vector + SH basis row (tiny, plain JAX) ---
    rv = jax.random.normal(key, (N_POINTS, 3), dtype=jnp.float32)
    rv = rv / jnp.linalg.norm(rv, axis=1, keepdims=True)
    sh_row = _real_sph_harm_lmax2(rv)[0]                    # (9,), N_POINTS == 1

    q = _pick_q(b)
    use_mxu = (q >= 8) and (b >= _MIN_MXU_BATCH)
    if use_mxu:
        # Free contiguous reshape (no HBM copy): (B, 9) -> (B/q, q*9).
        w9 = q * DIM
        rows = b // q
        inp = input_coeffs.reshape(rows, w9)
        tgt = target_coeffs.reshape(rows, w9)
        wmat = _block_diag_sh(sh_row, q)                    # (w9, 128), resident block
        w_spec = pl.BlockSpec((w9, 128), lambda i: (0, 0))
        row_bytes = ((w9 + 127) // 128) * 128 * 4           # padded VMEM bytes per block row
    else:
        # Lane-sparse fallback (tiny or divisor-less B): original (B, 9) layout, VPU dot.
        w9 = DIM
        rows = b
        inp, tgt = input_coeffs, target_coeffs
        wmat = sh_row.reshape(1, DIM).astype(jnp.float32)
        w_spec = pl.BlockSpec((1, DIM), lambda i: (0, 0))
        row_bytes = 128 * 4

    num_tiles, tbr, need_mask = _tile_rows(rows, row_bytes, tile_bytes)
    kernel = _make_kernel(use_mxu, tbr, rows, need_mask)

    def run(dim_sem):
        return pl.pallas_call(
            kernel,
            out_shape=jax.ShapeDtypeStruct((num_tiles, 8, 128), jnp.float32),
            grid=(num_tiles,),
            in_specs=[
                w_spec,                                      # SH weights, same block every step
                pl.BlockSpec((tbr, w9), lambda i: (i, 0)),   # input coefficient tile
                pl.BlockSpec((tbr, w9), lambda i: (i, 0)),   # target coefficient tile
            ],
            out_specs=pl.BlockSpec((1, 8, 128), lambda i: (i, 0, 0)),
            compiler_params=pltpu.CompilerParams(dimension_semantics=dim_sem),
        )(wmat, inp, tgt)

    dim_sem = _dimension_semantics(num_tiles)
    if dim_sem == ("parallel",):
        partials = run(dim_sem)
    else:
        try:
            partials = run(dim_sem)              # CORE_PARALLEL on v7x
        except Exception:
            partials = run(("parallel",))        # safe single-core fallback
    return jnp.sum(partials[:, 0, 0])


def _reference_loss(input_coeffs, target_coeffs, key):
    """Pure-JAX mirror of the PyTorch forward (exact f32 elementwise dot)."""
    rv = jax.random.normal(key, (N_POINTS, 3), dtype=jnp.float32)
    rv = rv / jnp.linalg.norm(rv, axis=1, keepdims=True)
    sh = _real_sph_harm_lmax2(rv)[0]                                        # (9,)
    ip = jnp.abs(jnp.sum(input_coeffs.astype(jnp.float32) * sh, axis=-1))   # (B,)
    tp = jnp.abs(jnp.sum(target_coeffs.astype(jnp.float32) * sh, axis=-1))
    return jnp.sum(jnp.maximum(ip, tp)) - jnp.sum(jnp.minimum(ip, tp))


if __name__ == "__main__":
    key = jax.random.PRNGKey(0)
    k_pts, k1, k2, k3, k4 = jax.random.split(key, 5)

    def check(inp, tgt, **kw):
        loss = reconstruction_loss(inp, tgt, k_pts, **kw)
        jax.block_until_ready(loss)
        ref = _reference_loss(inp, tgt, k_pts)
        assert jnp.allclose(loss, ref, rtol=5e-4, atol=5e-4), (loss, ref)

    # 1) tiny batch (module's typical usage) -> VPU fallback path, single tile
    b1 = 2
    check(jax.random.normal(k1, (b1, DIM), jnp.float32),
          jax.random.normal(k2, (b1, DIM), jnp.float32))

    # 2) B % 128 == 0 -> fully lane-dense MXU path; a small tile budget forces multiple
    #    grid tiles and exercises the in-kernel tail mask (21 rows covered by 3 x 8)
    b2 = 2688  # 128 * 21
    inp2 = jax.random.normal(k3, (b2, DIM), jnp.float32)
    tgt2 = jax.random.normal(k4, (b2, DIM), jnp.float32)
    check(inp2, tgt2, tile_bytes=40 * 1024)

    # 3) same data ingested as bf16 (upcast happens inside the kernel, no wrapper copy)
    check(inp2.astype(jnp.bfloat16), tgt2.astype(jnp.bfloat16), tile_bytes=40 * 1024)

    # 4) small awkward batch -> VPU path with multiple tiles + tail mask (no padding)
    b4 = 20
    check(jax.random.normal(k1, (b4, DIM), jnp.float32),
          jax.random.normal(k2, (b4, DIM), jnp.float32), tile_bytes=4 * 1024)

    print("KERNEL_OK")
</pallas_src>

<mosaic_0001>
module attributes {stable_mosaic.version = 11 : i64} {
  func.func @kernel(%arg0: i32, %arg1: memref<1x9xf32, #tpu.memory_space<vmem>>, %arg2: memref<2x9xf32, #tpu.memory_space<vmem>>, %arg3: memref<2x9xf32, #tpu.memory_space<vmem>>, %arg4: memref<1x8x128xf32, #tpu.memory_space<vmem>>) attributes {dimension_semantics = [#tpu.dimension_semantics<parallel>], iteration_bounds = array<i64: 1>, scalar_prefetch = 0 : i64, scratch_operands = 0 : i64, tpu.core_type = #tpu.core_type<tc>, window_params = [{pipeline_mode = #tpu.pipeline_mode<synchronous>, transform_indices = @transform_0, window_bounds = array<i64: 1, 9>}, {transform_indices = @transform_1, window_bounds = array<i64: 2, 9>}, {transform_indices = @transform_2, window_bounds = array<i64: 2, 9>}, {transform_indices = @transform_3, window_bounds = array<i64: 1, 8, 128>}]} {
    %c0 = arith.constant 0 : index
    %c0_0 = arith.constant 0 : index
    %0 = vector.load %arg2[%c0, %c0_0] : memref<2x9xf32, #tpu.memory_space<vmem>>, vector<2x9xf32>
    %c0_1 = arith.constant 0 : index
    %c0_2 = arith.constant 0 : index
    %1 = vector.load %arg3[%c0_1, %c0_2] : memref<2x9xf32, #tpu.memory_space<vmem>>, vector<2x9xf32>
    %c0_3 = arith.constant 0 : index
    %c0_4 = arith.constant 0 : index
    %2 = vector.load %arg1[%c0_3, %c0_4] : memref<1x9xf32, #tpu.memory_space<vmem>>, vector<1x9xf32>
    %3 = vector.broadcast %2 : vector<1x9xf32> to vector<2x9xf32>
    %4 = arith.mulf %0, %3 : vector<2x9xf32>
    %cst = arith.constant dense<0.000000e+00> : vector<2xf32>
    %5 = vector.multi_reduction <add>, %4, %cst [1] : vector<2x9xf32> to vector<2xf32>
    %6 = vector.shape_cast %5 : vector<2xf32> to vector<2x1xf32>
    %7 = vector.broadcast %2 : vector<1x9xf32> to vector<2x9xf32>
    %8 = arith.mulf %1, %7 : vector<2x9xf32>
    %cst_5 = arith.constant dense<0.000000e+00> : vector<2xf32>
    %9 = vector.multi_reduction <add>, %8, %cst_5 [1] : vector<2x9xf32> to vector<2xf32>
    %10 = vector.shape_cast %9 : vector<2xf32> to vector<2x1xf32>
    %11 = math.absf %6 : vector<2x1xf32>
    %12 = math.absf %10 : vector<2x1xf32>
    %13 = arith.subf %11, %12 : vector<2x1xf32>
    %14 = math.absf %13 : vector<2x1xf32>
    %15 = vector.shape_cast %14 : vector<2x1xf32> to vector<1x2x1xf32>
    %cst_6 = arith.constant dense<0.000000e+00> : vector<1xf32>
    %16 = vector.multi_reduction <add>, %15, %cst_6 [1, 2] : vector<1x2x1xf32> to vector<1xf32>
    %17 = vector.shape_cast %16 : vector<1xf32> to vector<1x1x1xf32>
    %18 = vector.extract %17[0, 0, 0] : f32 from vector<1x1x1xf32>
    %19 = vector.broadcast %18 : f32 to vector<1x8x128xf32>
    %c0_7 = arith.constant 0 : index
    %c0_8 = arith.constant 0 : index
    %c0_9 = arith.constant 0 : index
    %20 = vector.load %arg4[%c0_7, %c0_8, %c0_9] : memref<1x8x128xf32, #tpu.memory_space<vmem>>, vector<1x8x128xf32>
    tpu.vector_store %arg4[%c0_7, %c0_8, %c0_9], %19 {strides = array<i32>} : memref<1x8x128xf32, #tpu.memory_space<vmem>>, vector<1x8x128xf32>,
    return
  }
  func.func @transform_0(%arg0: i32) -> (i32, i32) {
    %c0_i32 = arith.constant 0 : i32
    %c0_i32_0 = arith.constant 0 : i32
    %c0_i32_1 = arith.constant 0 : i32
    return %c0_i32, %c0_i32_0 : i32, i32
  }
  func.func @transform_1(%arg0: i32) -> (i32, i32) {
    %c0_i32 = arith.constant 0 : i32
    %c0_i32_0 = arith.constant 0 : i32
    return %arg0, %c0_i32 : i32, i32
  }
  func.func @transform_2(%arg0: i32) -> (i32, i32) {
    %c0_i32 = arith.constant 0 : i32
    %c0_i32_0 = arith.constant 0 : i32
    return %arg0, %c0_i32 : i32, i32
  }
  func.func @transform_3(%arg0: i32) -> (i32, i32, i32) {
    %c0_i32 = arith.constant 0 : i32
    %c0_i32_0 = arith.constant 0 : i32
    %c0_i32_1 = arith.constant 0 : i32
    return %arg0, %c0_i32, %c0_i32_0 : i32, i32, i32
  }
}

</mosaic_0001>

<bundles_post_ra>
// kernel: tpu_custom_call.1
= control target key start
LH: loop header
LB: loop body
LE: loop exit
PB: predicated region body
PF: predicated region fallthrough
CT: control target
= control target key end

     0   :  { %8 = vsyncpa [#allocation3], 0  ;;  %s182_s0 = inlined_call_operand.hbm [shape: f32[1,9], index: 0, kind: input, shape index: {}]   ;;  %s183_s1 = inlined_call_operand.vmem [shape: f32[2,9], index: 1, kind: input, shape index: {}]   ;;  %s184_s2 = inlined_call_operand.vmem [shape: f32[2,9], index: 2, kind: input, shape index: {}]   ;;  %s185_s3 = inlined_call_operand.hbm [shape: f32[1,8,128], index: 3, kind: output, shape index: {}]  }
   0x1   :  { %9 = vsyncpa [#allocation4], 0  ;;  %s130_s12 = smov [#allocation2]   ;;  %s82_s16 = scalar_lea.hbm %s182_s0, 16 }
   0x2   :  { %s16_s13 = sshll.u32 %s130_s12, 4  ;;  %p83_p0 = scmp.ne.s32.totalorder %s182_s0, %s82_s16  ;;  %s17_s13 = int_to_ptr.vmem [resolvable:$true] %s16_s13 }
   0x3   :  { %p86_p1 = scmp.lt.u32.totalorder %s82_s16, %s182_s0 }
   0x5   :  { %p88_p2 = pnand %p86_p1, %p83_p0 }
   0x7   :  { %91 = shalt.err (!%p88_p2)
}
   0x8   :  { %s92_s21 = scalar_lea.vmem %s17_s13, 16  ;;  %s96_s22 = scalar_lea.vmem %s17_s13, 32 }
   0x9   :  { %p93_p3 = scmp.ne.s32.totalorder %s17_s13, %s92_s21  ;;  %p97_p4 = scmp.lt.s32.totalorder %s17_s13, %s17_s13 }
   0xa   :  { %p98_p5 = scmp.lt.s32.totalorder %s96_s22, %s92_s21 }
   0xc   :  { %p99_p6 = por %p98_p5, %p97_p4 }
   0xe   :  { %p100_p7 = pnand %p99_p6, %p93_p3 }
  0x10   :  { %103 = shalt.err (!%p100_p7)
}
  0x11   :  { %19 = dma.hbm_to_vmem [thread:$0]  %s182_s0, 16, %s17_s13, [#allocation3]  }
  0x12   :  { %126 = dma.done.wait [#allocation3], 16  }
  0x13   :  { %127 = vsyncadd [#allocation3], 4294967280  ;;  %vm37_vm0 = vcmask 66560   ;;  %v27_v0 = vld [vmem:[%s183_s1] sm:$0x3]  ;;  %vm49_vm1 = vcmask 1024  }
  0x14   :  { %v77_v1 = vld [vmem:[#allocation2] ss:$0 sm:$0xff]  ;;  %v28_v2 = vld [vmem:[%s184_s2] sm:$0x3]  ;;  %s131_s0 = smov [#allocation5]  }
  0x15   :  { %v36_v3 = vmul.f32 %v77_v1, %v27_v0  ;;  %v41_v4 = vmul.f32 %v77_v1, %v28_v2  ;;  %s68_s1 = sshll.u32 %s131_s0, 4  ;;  %s69_s1 = int_to_ptr.vmem [resolvable:$true] %s68_s1 }
  0x16   :  { %s104_s29 = scalar_lea.vmem %s69_s1, 128  ;;  %p109_p9 = scmp.lt.s32.totalorder %s69_s1, %s69_s1 }
  0x17   :  { %v38_v5 = vsel %vm37_vm0, %v36_v3, 0.0  ;;  %v42_v6 = vsel %vm37_vm0, %v41_v4, 0.0  ;;  %p105_p8 = scmp.ne.s32.totalorder %s69_s1, %s104_s29  ;;  %p110_p10 = scmp.lt.s32.totalorder %s104_s29, %s104_s29 }
  0x18   :  { %39 = vadd.xlane.f32.xlu0 %v38_v5 }
  0x19   :  { %p111_p11 = por %p110_p10, %p109_p9 }
  0x1b   :  { %p112_p12 = pnand %p111_p11, %p105_p8 }
  0x1c   :  { %43 = vadd.xlane.f32.xlu0 %v42_v6 }
  0xa5   :  { %v40_v7 = vpop.xlane.xlu0 %39 }
  0xa6   :  { %v45_v9 = vand.u32 2147483647, %v40_v7 }
  0xa9   :  { %v44_v8 = vpop.xlane.xlu0 %43 }
  0xaa   :  { %v46_v10 = vand.u32 2147483647, %v44_v8 }
  0xac   :  { %v47_v11 = vsub.f32 %v45_v9, %v46_v10 }
  0xae   :  { %v48_v12 = vand.u32 2147483647, %v47_v11 }
  0xb0   :  { %v50_v13 = vsel %vm49_vm1, %v48_v12, 0.0 }
  0xb1   :  { %51 = vadd.xlane.f32.xlu1 %v50_v13 }
 0x13e   :  { %v52_v14 = vpop.xlane.xlu1 %51 }
 0x13f   :  { %v53_v15 = vrot.slane %v52_v14, 4 }
 0x141   :  { %v54_v16 = vadd.f32 %v53_v15, %v52_v14 }
 0x143   :  { %v55_v17 = vrot.slane %v54_v16, 2 }
 0x145   :  { %v56_v18 = vadd.f32 %v55_v17, %v54_v16 }
 0x147   :  { %v57_v19 = vrot.slane %v56_v18, 1 }
 0x149   :  { %v58_v20 = vadd.f32 %v57_v19, %v56_v18 }
 0x14b   :  { %78 = vpush %v58_v20 }
 0x17c   :  { %s79_s2 = spop %78 }
 0x17d   :  { %v60_v21 = vstv %s79_s2 }
 0x17e   :  { %61 = vst [vmem:[#allocation5] sm:$0xff] %v60_v21 }
 0x17f   :  { %115 = shalt.err (!%p112_p12)
}
 0x180   :  { %s116_s5 = scalar_lea.hbm %s185_s3, 128 }
 0x181   :  { %p117_p13 = scmp.ne.s32.totalorder %s185_s3, %s116_s5  ;;  %p120_p0 = scmp.lt.u32.totalorder %s116_s5, %s185_s3 }
 0x183   :  { %p122_p1 = pnand %p120_p0, %p117_p13 }
 0x185   :  { %125 = shalt.err (!%p122_p1)
}
 0x186   :  { %71 = dma.vmem_to_hbm [thread:$0]  %s69_s1, 128, %s185_s3, [#allocation4]  }
 0x187   :  { %128 = dma.done.wait [#allocation4], 128  }
 0x188   :  { %129 = vsyncadd [#allocation4], 4294967168 }
 0x189   :  { %75 = vsyncpa [#allocation3], 1 }
 0x18a   :  { %76 = vsyncpa [#allocation4], 1 }

</bundles_post_ra>
